<compile_context>
chip_gen: v6e
topology: v6e:2x2x1
jax: 0.10.0
libtpu: 0.0.40
codegen_flags: <defaults>
</compile_context>

<pallas_src>
import functools

import jax
import jax.numpy as jnp
from jax.experimental import pallas as pl
from jax.experimental.pallas import tpu as pltpu


def _nce_kernel(pred_ref, labels_ref, w_ref, out_ref, *,
                num_classes, tile_n, n_actual, mask_rows):
    """Per-tile partial sums of (nce_n, w_n) over tile_n rows."""
    pred = pred_ref[...].astype(jnp.float32)          # (TN, C)
    labels = labels_ref[...]                          # (TN, 1) int32
    w_row = w_ref[...]                                 # (TN, 1) f32  == weight[labels]

    # Centered log-softmax statistics; logp is never materialized:
    #   logp = (pred - m) - log(sum(exp(pred - m)))
    m = jnp.max(pred, axis=1, keepdims=True)                        # (TN, 1)
    pm = pred - m                                                   # (TN, C) centered
    sumexp = jnp.sum(jnp.exp(pm), axis=1, keepdims=True)            # (TN, 1)
    log_sumexp = jnp.log(sumexp)                                    # (TN, 1)

    # pred-at-label via iota/compare select (no one_hot materialization, no gather).
    cls_ids = jax.lax.broadcasted_iota(jnp.int32, (tile_n, num_classes), 1)
    pm_label = jnp.sum(jnp.where(cls_ids == labels, pm, 0.0),
                       axis=1, keepdims=True)                       # (TN, 1)
    sum_pm = jnp.sum(pm, axis=1, keepdims=True)                     # (TN, 1)

    lp_label = pm_label - log_sumexp                                # logp[n, labels[n]]
    denom = sum_pm - num_classes * log_sumexp                       # sum_c logp[n, c]
    # NOTE: denom == 0 only in degenerate cases (C == 1 / all mass on one class);
    # the PyTorch reference divides by the same quantity, so we keep parity.

    # nce_n = -(w * logp[label]) / (-sum_c logp) = w * logp[label] / sum_c logp
    nce_row = w_row * lp_label / denom                              # (TN, 1)

    if mask_rows:
        row_ids = (pl.program_id(0) * tile_n
                   + jax.lax.broadcasted_iota(jnp.int32, (tile_n, 1), 0))
        valid = (row_ids < n_actual).astype(jnp.float32)
        nce_row = nce_row * valid
        w_row = w_row * valid

    sum_nce = jnp.sum(nce_row)
    sum_w = jnp.sum(w_row)

    # Lane-dense (1, 1, 128) partial-sum block: lane 0 = sum_nce, lane 1 = sum_w.
    lane = jax.lax.broadcasted_iota(jnp.int32, (1, 1, 128), 2)
    out_ref[...] = jnp.where(lane == 0, sum_nce,
                             jnp.where(lane == 1, sum_w, 0.0))


def _round_down8(x):
    return max(8, (int(x) // 8) * 8)


def _round_up8(x):
    return max(8, ((int(x) + 7) // 8) * 8)


def _vmem_budget_bytes():
    phys = 64 << 20                           # conservative fallback (v7x per-TC)
    try:
        info = pltpu.get_tpu_info()
        cap = getattr(info, "vmem_capacity_bytes", None)
        if cap:
            phys = int(cap)
    except Exception:
        pass
    return int(phys * 0.70)                   # headroom for compiler internal scratch


def normalized_cross_entropy(pred, labels, class_weight, *, scale=1.0, tile_n=None):
    """pred: (N, C) float, labels: (N,) int, class_weight: (C,) float -> scalar f32."""
    n, c = pred.shape
    itemsize = jnp.dtype(pred.dtype).itemsize

    labels = labels.astype(jnp.int32)
    # Per-sample weight gather hoisted out of the kernel (4 B/row of extra DMA).
    w_rows = class_weight.astype(jnp.float32)[labels].reshape(n, 1)

    vmem_budget = _vmem_budget_bytes()
    # Per-row VMEM: double-buffered pred tile + ~4 live (tn, C) f32 temporaries
    # (f32 cast, pred - m, exp, masked select) + double-buffered (tn, 1) labels/weights.
    per_row = 2 * c * itemsize + 4 * c * 4 + 4 * 4
    tn_vmem = _round_down8(vmem_budget // per_row)

    if tile_n is not None:
        tn = tile_n
    else:
        # Target ~4 MiB of pred per block so the ~0.35 us per-grid-step overhead is
        # amortized and the DMA pipeline sits at HBM roofline; clamp by VMEM budget.
        target_pred_bytes = 4 << 20
        tn = min(_round_down8(target_pred_bytes // max(1, c * itemsize)), tn_vmem)

    if n <= tn:
        tn = n
        num_tiles = 1
        n_pad = n
    else:
        assert tn % 8 == 0, "row tile must be a multiple of 8 when tiling over rows"
        num_tiles = pl.cdiv(n, tn)
        if tile_n is None and num_tiles > 2 and num_tiles % 2 == 1:
            # Prefer an even tile count so both TensorCores (v7x) get balanced halves.
            tn_alt = _round_up8(pl.cdiv(n, num_tiles + 1))
            nt_alt = pl.cdiv(n, tn_alt)
            if nt_alt >= 2 and nt_alt % 2 == 0 and tn_alt <= tn_vmem:
                tn, num_tiles = tn_alt, nt_alt
        n_pad = num_tiles * tn

    # TODO(synk): for vocab-scale C, add a trailing "arbitrary" grid axis over C with
    # online (flash-style) max/exp-sum accumulation instead of full-row class blocks.

    if n_pad != n:
        pred = jnp.pad(pred, ((0, n_pad - n), (0, 0)))
        labels = jnp.pad(labels, ((0, n_pad - n),))
        w_rows = jnp.pad(w_rows, ((0, n_pad - n), (0, 0)))   # zero weight => no contribution
    labels2 = labels.reshape(n_pad, 1)

    kernel = functools.partial(
        _nce_kernel,
        num_classes=c,
        tile_n=tn,
        n_actual=n,
        mask_rows=(n_pad != n),
    )

    cost = pl.CostEstimate(
        flops=6 * n_pad * c + 8 * n_pad,
        transcendentals=n_pad * c + n_pad,
        bytes_accessed=n_pad * c * itemsize + n_pad * 8 + num_tiles * 128 * 4,
    )

    partials = pl.pallas_call(
        kernel,
        out_shape=jax.ShapeDtypeStruct((num_tiles, 1, 128), jnp.float32),
        grid=(num_tiles,),
        in_specs=[
            pl.BlockSpec((tn, c), lambda i: (i, 0)),
            pl.BlockSpec((tn, 1), lambda i: (i, 0)),
            pl.BlockSpec((tn, 1), lambda i: (i, 0)),
        ],
        out_specs=pl.BlockSpec((1, 1, 128), lambda i: (i, 0, 0)),
        compiler_params=pltpu.CompilerParams(
            dimension_semantics=("parallel",),
            vmem_limit_bytes=vmem_budget,
        ),
        cost_estimate=cost,
    )(pred, labels2, w_rows)

    # Final cross-tile reduction + normalization (tiny, done in plain JAX).
    sum_nce = jnp.sum(partials[:, 0, 0])
    sum_w = jnp.sum(partials[:, 0, 1])
    return (scale * sum_nce / sum_w).astype(jnp.float32)


def _reference(pred, labels, class_weight, scale=1.0):
    logp = jax.nn.log_softmax(pred.astype(jnp.float32), axis=1)
    one_hot = jax.nn.one_hot(labels, pred.shape[1], dtype=jnp.float32)
    w = class_weight[labels]                                   # (N,)
    nce_row = w * jnp.sum(one_hot * logp, axis=1) / jnp.sum(logp, axis=1)
    return scale * jnp.sum(nce_row) / jnp.sum(w)


if __name__ == "__main__":
    key = jax.random.PRNGKey(0)
    k1, k2, k3 = jax.random.split(key, 3)

    batch = 50           # deliberately not a multiple of the forced test tile -> masking
    num_classes = 32
    scale = 1.0

    pred = jax.random.normal(k1, (batch, num_classes), dtype=jnp.float32)
    labels = jax.random.randint(k2, (batch,), 0, num_classes, dtype=jnp.int32)
    class_weight = jax.random.uniform(
        k3, (num_classes,), dtype=jnp.float32, minval=0.5, maxval=1.5
    )

    ref = _reference(pred, labels, class_weight, scale=scale)

    # Auto-sized tile path (single full-array block at these small shapes).
    out_auto = normalized_cross_entropy(pred, labels, class_weight, scale=scale)
    out_auto = jax.block_until_ready(out_auto)
    assert jnp.allclose(out_auto, ref, rtol=2e-5, atol=1e-6), (out_auto, ref)

    # Forced multi-tile path (grid over rows, padded + masked last tile).
    out_tiled = normalized_cross_entropy(pred, labels, class_weight,
                                         scale=scale, tile_n=16)
    out_tiled = jax.block_until_ready(out_tiled)
    assert jnp.allclose(out_tiled, ref, rtol=2e-5, atol=1e-6), (out_tiled, ref)

    print("KERNEL_OK")
</pallas_src>

<mosaic_0001>
module attributes {stable_mosaic.version = 11 : i64} {
  func.func @_nce_kernel(%arg0: i32, %arg1: memref<50x32xf32, #tpu.memory_space<vmem>>, %arg2: memref<50x1xi32, #tpu.memory_space<vmem>>, %arg3: memref<50x1xf32, #tpu.memory_space<vmem>>, %arg4: memref<1x1x128xf32, #tpu.memory_space<vmem>>) attributes {dimension_semantics = [#tpu.dimension_semantics<parallel>], iteration_bounds = array<i64: 1>, scalar_prefetch = 0 : i64, scratch_operands = 0 : i64, tpu.core_type = #tpu.core_type<tc>, window_params = [{transform_indices = @transform_0, window_bounds = array<i64: 50, 32>}, {transform_indices = @transform_1, window_bounds = array<i64: 50, 1>}, {transform_indices = @transform_2, window_bounds = array<i64: 50, 1>}, {transform_indices = @transform_3, window_bounds = array<i64: 1, 1, 128>}]} {
    %c0 = arith.constant 0 : index
    %c0_0 = arith.constant 0 : index
    %0 = vector.load %arg1[%c0, %c0_0] : memref<50x32xf32, #tpu.memory_space<vmem>>, vector<50x32xf32>
    %c0_1 = arith.constant 0 : index
    %c0_2 = arith.constant 0 : index
    %1 = vector.load %arg2[%c0_1, %c0_2] : memref<50x1xi32, #tpu.memory_space<vmem>>, vector<50x1xi32>
    %c0_3 = arith.constant 0 : index
    %c0_4 = arith.constant 0 : index
    %2 = vector.load %arg3[%c0_3, %c0_4] : memref<50x1xf32, #tpu.memory_space<vmem>>, vector<50x1xf32>
    %cst = arith.constant dense<0xFF800000> : vector<50xf32>
    %3 = vector.multi_reduction <maximumf>, %0, %cst [1] : vector<50x32xf32> to vector<50xf32>
    %4 = vector.shape_cast %3 : vector<50xf32> to vector<50x1xf32>
    %5 = vector.broadcast %4 : vector<50x1xf32> to vector<50x32xf32>
    %6 = arith.subf %0, %5 : vector<50x32xf32>
    %7 = math.exp %6 : vector<50x32xf32>
    %cst_5 = arith.constant dense<0.000000e+00> : vector<50xf32>
    %8 = vector.multi_reduction <add>, %7, %cst_5 [1] : vector<50x32xf32> to vector<50xf32>
    %9 = vector.shape_cast %8 : vector<50xf32> to vector<50x1xf32>
    %10 = math.log %9 : vector<50x1xf32>
    %11 = tpu.iota {dimensions = array<i32: 1>} : vector<50x32xi32>
    %12 = vector.broadcast %1 : vector<50x1xi32> to vector<50x32xi32>
    %13 = arith.cmpi eq, %11, %12 : vector<50x32xi32>
    %cst_6 = arith.constant 0.000000e+00 : f32
    %14 = vector.broadcast %cst_6 : f32 to vector<50x32xf32>
    %15 = arith.select %13, %6, %14 : vector<50x32xi1>, vector<50x32xf32>
    %cst_7 = arith.constant dense<0.000000e+00> : vector<50xf32>
    %16 = vector.multi_reduction <add>, %15, %cst_7 [1] : vector<50x32xf32> to vector<50xf32>
    %17 = vector.shape_cast %16 : vector<50xf32> to vector<50x1xf32>
    %cst_8 = arith.constant dense<0.000000e+00> : vector<50xf32>
    %18 = vector.multi_reduction <add>, %6, %cst_8 [1] : vector<50x32xf32> to vector<50xf32>
    %19 = vector.shape_cast %18 : vector<50xf32> to vector<50x1xf32>
    %20 = arith.subf %17, %10 : vector<50x1xf32>
    %cst_9 = arith.constant 3.200000e+01 : f32
    %21 = vector.broadcast %cst_9 : f32 to vector<50x1xf32>
    %22 = arith.mulf %21, %10 : vector<50x1xf32>
    %23 = arith.subf %19, %22 : vector<50x1xf32>
    %24 = arith.mulf %2, %20 : vector<50x1xf32>
    %25 = arith.divf %24, %23 : vector<50x1xf32>
    %26 = vector.shape_cast %25 : vector<50x1xf32> to vector<1x50x1xf32>
    %cst_10 = arith.constant dense<0.000000e+00> : vector<1xf32>
    %27 = vector.multi_reduction <add>, %26, %cst_10 [1, 2] : vector<1x50x1xf32> to vector<1xf32>
    %28 = vector.shape_cast %27 : vector<1xf32> to vector<1x1x1xf32>
    %29 = vector.extract %28[0, 0, 0] : f32 from vector<1x1x1xf32>
    %30 = vector.shape_cast %2 : vector<50x1xf32> to vector<1x50x1xf32>
    %cst_11 = arith.constant dense<0.000000e+00> : vector<1xf32>
    %31 = vector.multi_reduction <add>, %30, %cst_11 [1, 2] : vector<1x50x1xf32> to vector<1xf32>
    %32 = vector.shape_cast %31 : vector<1xf32> to vector<1x1x1xf32>
    %33 = vector.extract %32[0, 0, 0] : f32 from vector<1x1x1xf32>
    %34 = tpu.iota {dimensions = array<i32: 2>} : vector<1x1x128xi32>
    %c0_i32 = arith.constant 0 : i32
    %35 = vector.broadcast %c0_i32 : i32 to vector<1x1x128xi32>
    %36 = arith.cmpi eq, %34, %35 : vector<1x1x128xi32>
    %c1_i32 = arith.constant 1 : i32
    %37 = vector.broadcast %c1_i32 : i32 to vector<1x1x128xi32>
    %38 = arith.cmpi eq, %34, %37 : vector<1x1x128xi32>
    %cst_12 = arith.constant 0.000000e+00 : f32
    %39 = vector.broadcast %33 : f32 to vector<1x1x128xf32>
    %40 = vector.broadcast %cst_12 : f32 to vector<1x1x128xf32>
    %41 = arith.select %38, %39, %40 : vector<1x1x128xi1>, vector<1x1x128xf32>
    %42 = vector.broadcast %29 : f32 to vector<1x1x128xf32>
    %43 = arith.select %36, %42, %41 : vector<1x1x128xi1>, vector<1x1x128xf32>
    %c0_13 = arith.constant 0 : index
    %c0_14 = arith.constant 0 : index
    %c0_15 = arith.constant 0 : index
    %44 = vector.load %arg4[%c0_13, %c0_14, %c0_15] : memref<1x1x128xf32, #tpu.memory_space<vmem>>, vector<1x1x128xf32>
    tpu.vector_store %arg4[%c0_13, %c0_14, %c0_15], %43 {strides = array<i32>} : memref<1x1x128xf32, #tpu.memory_space<vmem>>, vector<1x1x128xf32>,
    return
  }
  func.func @transform_0(%arg0: i32) -> (i32, i32) {
    %c0_i32 = arith.constant 0 : i32
    %c0_i32_0 = arith.constant 0 : i32
    return %arg0, %c0_i32 : i32, i32
  }
  func.func @transform_1(%arg0: i32) -> (i32, i32) {
    %c0_i32 = arith.constant 0 : i32
    %c0_i32_0 = arith.constant 0 : i32
    return %arg0, %c0_i32 : i32, i32
  }
  func.func @transform_2(%arg0: i32) -> (i32, i32) {
    %c0_i32 = arith.constant 0 : i32
    %c0_i32_0 = arith.constant 0 : i32
    return %arg0, %c0_i32 : i32, i32
  }
  func.func @transform_3(%arg0: i32) -> (i32, i32, i32) {
    %c0_i32 = arith.constant 0 : i32
    %c0_i32_0 = arith.constant 0 : i32
    %c0_i32_1 = arith.constant 0 : i32
    return %arg0, %c0_i32, %c0_i32_0 : i32, i32, i32
  }
}

</mosaic_0001>

<bundles_post_ra>
// kernel: tpu_custom_call.1
= control target key start
LH: loop header
LB: loop body
LE: loop exit
PB: predicated region body
PF: predicated region fallthrough
CT: control target
= control target key end

     0   :  { %vm36_vm0 = vcmask 261120   ;;  %v375_v6 = vmov 0   ;;  %s579_s0 = inlined_call_operand.vmem [shape: f32[50,32], index: 0, kind: input, shape index: {}]   ;;  %s580_s1 = inlined_call_operand.vmem [shape: s32[50,1], index: 1, kind: input, shape index: {}]   ;;  %s581_s2 = inlined_call_operand.vmem [shape: f32[50,1], index: 2, kind: input, shape index: {}]   ;;  %s582_s3 = inlined_call_operand.hbm [shape: f32[1,1,128], index: 3, kind: output, shape index: {}]  }
   0x1   :  { %v17_v0 = vld [vmem:[%s579_s0 + $0x10] sm:$0xff]  ;;  %v15_v1 = vld [vmem:[%s579_s0] sm:$0xff]  ;;  %v18_v2 = vld [vmem:[%s579_s0 + $0x18] sm:$0xff]  ;;  %309 = vset.pattern.permute.xlu1 %v375_v6  ;;  %310 = vset.pattern.permute.xlu0 %v375_v6 }
   0x2   :  { %v43_v3 = vsel %vm36_vm0, %v17_v0, -inf  ;;  %v37_v4 = vsel %vm36_vm0, %v15_v1, -inf  ;;  %v16_v5 = vld [vmem:[%s579_s0 + $0x8] sm:$0xff]  ;;  %v46_v7 = vsel %vm36_vm0, %v18_v2, -inf  ;;  %v19_v10 = vld [vmem:[%s579_s0 + $0x20] sm:$0xff] }
   0x3   :  { %44 = vmax.xlane.f32.xlu1 %v43_v3  ;;  %38 = vmax.xlane.f32.xlu0 %v37_v4  ;;  %v40_v8 = vsel %vm36_vm0, %v16_v5, -inf  ;;  %v20_v9 = vld [vmem:[%s579_s0 + $0x28] sm:$0xff] }
   0x4   :  { %8 = vsyncpa [#allocation3], 0  ;;  %v52_v11 = vsel %vm36_vm0, %v20_v9, -inf  ;;  %v49_v12 = vsel %vm36_vm0, %v19_v10, -inf  ;;  %v21_v13 = vld [vmem:[%s579_s0 + $0x30] sm:$0x3]  ;;  %v115_v60 = vlaneseq }
   0x5   :  { %vm55_vm1 = vcmask 254976   ;;  %v22_v15 = vld [vmem:[%s580_s1] sm:$0xff]  ;;  %v24_v16 = vld [vmem:[%s580_s1 + $0x10] sm:$0xff]  ;;  %v25_v17 = vld [vmem:[%s580_s1 + $0x18] sm:$0xff]  ;;  %vm236_vm9 = vcmask 7168   ;;  %vm248_vm10 = vcmask 1024  }
   0x6   :  { %v56_v14 = vsel %vm55_vm1, %v21_v13, -inf  ;;  %v23_v18 = vld [vmem:[%s580_s1 + $0x8] sm:$0xff]  ;;  %v26_v19 = vld [vmem:[%s580_s1 + $0x20] sm:$0xff]  ;;  %v28_v21 = vld [vmem:[%s580_s1 + $0x30] sm:$0x3]  ;;  %v478_v63 = vand.u32 127, %v115_v60 }
   0x7   :  { %47 = vmax.xlane.f32.xlu1 %v46_v7  ;;  %41 = vmax.xlane.f32.xlu0 %v40_v8  ;;  %v27_v20 = vld [vmem:[%s580_s1 + $0x28] sm:$0xff]  ;;  %s376_s25 = smov [#allocation2]  }
   0x8   :  { %vm283_vm11 = vcmp.eq.s32.totalorder %v478_v63, 1  ;;  %s295_s26 = sshll.u32 %s376_s25, 4  ;;  %vm282_vm12 = vcmp.eq.s32.totalorder %v478_v63, 0  ;;  %s296_s26 = int_to_ptr.vmem [resolvable:$true] %s295_s26 }
   0x9   :  { %s353_s28 = scalar_lea.vmem %s296_s26, 16  ;;  %s357_s29 = scalar_lea.vmem %s296_s26, 32 }
   0xa   :  { %p354_p0 = scmp.ne.s32.totalorder %s296_s26, %s353_s28  ;;  %p358_p1 = scmp.lt.s32.totalorder %s296_s26, %s296_s26 }
   0xb   :  { %53 = vmax.xlane.f32.xlu1 %v52_v11  ;;  %50 = vmax.xlane.f32.xlu0 %v49_v12  ;;  %p359_p2 = scmp.lt.s32.totalorder %s357_s29, %s353_s28 }
   0xd   :  { %p360_p3 = por %p359_p2, %p358_p1 }
   0xf   :  { %57 = vmax.xlane.f32.xlu0 %v56_v14  ;;  %p361_p4 = pnand %p360_p3, %p354_p0 }
  0x1c   :  { %118 = vperm.xlu1 %309, %v22_v15  }
  0x20   :  { %124 = vperm.xlu1 %309, %v24_v16  }
  0x24   :  { %127 = vperm.xlu1 %309, %v25_v17  }
  0x25   :  { %121 = vperm.xlu0 %310, %v23_v18  }
  0x28   :  { %130 = vperm.xlu1 %309, %v26_v19  }
  0x2c   :  { %133 = vperm.xlu1 %309, %v27_v20  }
  0x30   :  { %136 = vperm.xlu1 %309, %v28_v21  }
  0x8c   :  { %v45_v22 = vpop.xlane.xlu1 %44  ;;  %v39_v23 = vpop.xlane.xlu0 %38 }
  0x8d   :  { %v446_v24 = vsub.f32 %v17_v0, %v45_v22  ;;  %v448_v25 = vsub.f32 %v15_v1, %v39_v23  ;;  %v514_v23 = vld [vmem:[%s581_s2] sm:$0xff] }
  0x8f   :  { %v70_v26 = vmul.f32 1.442695, %v446_v24  ;;  %v66_v27 = vmul.f32 1.442695, %v448_v25  ;;  %v173_v61 = vsel %vm36_vm0, %v448_v25, 0.0  ;;  %v179_v1 = vsel %vm36_vm0, %v446_v24, 0.0 }
  0x90   :  { %v48_v28 = vpop.xlane.xlu1 %47  ;;  %v42_v29 = vpop.xlane.xlu0 %41 }
  0x91   :  { %311 = vpow2.f32 %v70_v26  ;;  %v452_v30 = vsub.f32 %v18_v2, %v48_v28  ;;  %v454_v31 = vsub.f32 %v16_v5, %v42_v29  ;;  %v528_v28 = vld [vmem:[%s581_s2 + $0x10] sm:$0xff] }
  0x92   :  { %313 = vpow2.f32 %v66_v27  ;;  %v263_v29 = vsel %vm236_vm9, %v528_v28, 0.0 }
  0x93   :  { %v72_v32 = vmul.f32 1.442695, %v452_v30  ;;  %v68_v33 = vmul.f32 1.442695, %v454_v31  ;;  %v176_v62 = vsel %vm36_vm0, %v454_v31, 0.0  ;;  %v182_v2 = vsel %vm36_vm0, %v452_v30, 0.0 }
  0x94   :  { %v54_v34 = vpop.xlane.xlu1 %53  ;;  %v51_v35 = vpop.xlane.xlu0 %50 }
  0x95   :  { %315 = vpow2.f32 %v72_v32  ;;  %v458_v36 = vsub.f32 %v20_v9, %v54_v34  ;;  %v460_v37 = vsub.f32 %v19_v10, %v51_v35  ;;  %v542_v34 = vld [vmem:[%s581_s2 + $0x20] sm:$0xff] }
  0x96   :  { %317 = vpow2.f32 %v68_v33  ;;  %v267_v35 = vsel %vm236_vm9, %v542_v34, 0.0 }
  0x97   :  { %v76_v38 = vmul.f32 1.442695, %v458_v36  ;;  %v74_v39 = vmul.f32 1.442695, %v460_v37  ;;  %v185_v4 = vsel %vm36_vm0, %v460_v37, 0.0  ;;  %v188_v5 = vsel %vm36_vm0, %v458_v36, 0.0 }
  0x98   :  { %v58_v40 = vpop.xlane.xlu0 %57  ;;  %v119_v46 = vpop.permute.xlu1 %118 }
  0x99   :  { %319 = vpow2.f32 %v76_v38  ;;  %v464_v41 = vsub.f32 %v21_v13, %v58_v40  ;;  %vm138_vm2 = vcmp.eq.s32.totalorder %v478_v63, %v119_v46 }
  0x9a   :  { %321 = vpow2.f32 %v74_v39  ;;  %v145_v7 = vsel %vm138_vm2, %v448_v25, 0.0  ;;  %v521_v25 = vld [vmem:[%s581_s2 + $0x8] sm:$0xff]  ;;  %v556_v39 = vld [vmem:[%s581_s2 + $0x30] sm:$0x3] }
  0x9b   :  { %v78_v42 = vmul.f32 1.442695, %v464_v41  ;;  %v191_v8 = vsel %vm55_vm1, %v464_v41, 0.0  ;;  %v152_v9 = vsel %vm36_vm0, %v145_v7, 0.0  ;;  %v261_v26 = vsel %vm236_vm9, %v521_v25, 0.0 }
  0x9c   :  { %v125_v54 = vpop.permute.xlu1 %124 }
  0x9d   :  { %323 = vpow2.f32 %v78_v42  ;;  %vm140_vm3 = vcmp.eq.s32.totalorder %v478_v63, %v125_v54 }
  0x9e   :  { %v312_v43 = vpop.eup %311  ;;  %v147_v10 = vsel %vm140_vm3, %v446_v24, 0.0  ;;  %v260_v24 = vsel %vm236_vm9, %v514_v23, 0.0 }
  0x9f   :  { %v314_v44 = vpop.eup %313  ;;  %v86_v48 = vsel %vm36_vm0, %v312_v43, 0.0  ;;  %v158_v13 = vsel %vm36_vm0, %v147_v10, 0.0  ;;  %v262_v27 = vadd.f32 %v261_v26, %v260_v24 }
  0xa0   :  { %v80_v45 = vsel %vm36_vm0, %v314_v44, 0.0  ;;  %v128_v59 = vpop.permute.xlu1 %127  ;;  %v122_v3 = vpop.permute.xlu0 %121 }
  0xa1   :  { %81 = vadd.xlane.f32.xlu1 %v80_v45  ;;  %vm139_vm4 = vcmp.eq.s32.totalorder %v478_v63, %v122_v3  ;;  %vm141_vm5 = vcmp.eq.s32.totalorder %v478_v63, %v128_v59 }
  0xa2   :  { %v316_v47 = vpop.eup %315  ;;  %v146_v11 = vsel %vm139_vm4, %v454_v31, 0.0  ;;  %v148_v16 = vsel %vm141_vm5, %v452_v30, 0.0  ;;  %v264_v30 = vadd.f32 %v263_v29, %v262_v27  ;;  %v535_v31 = vld [vmem:[%s581_s2 + $0x18] sm:$0xff] }
  0xa3   :  { %v318_v49 = vpop.eup %317  ;;  %v89_v52 = vsel %vm36_vm0, %v316_v47, 0.0  ;;  %v155_v14 = vsel %vm36_vm0, %v146_v11, 0.0  ;;  %v161_v18 = vsel %vm36_vm0, %v148_v16, 0.0  ;;  %v265_v32 = vsel %vm236_vm9, %v535_v31, 0.0 }
  0xa4   :  { %v83_v50 = vsel %vm36_vm0, %v318_v49, 0.0  ;;  %v131_v0 = vpop.permute.xlu1 %130  ;;  %v266_v33 = vadd.f32 %v265_v32, %v264_v30 }
  0xa5   :  { %87 = vadd.xlane.f32.xlu1 %v86_v48  ;;  %84 = vadd.xlane.f32.xlu0 %v83_v50  ;;  %vm142_vm6 = vcmp.eq.s32.totalorder %v478_v63, %v131_v0 }
  0xa6   :  { %v320_v51 = vpop.eup %319  ;;  %v149_v15 = vsel %vm142_vm6, %v460_v37, 0.0  ;;  %v268_v37 = vadd.f32 %v267_v35, %v266_v33 }
  0xa7   :  { %v322_v53 = vpop.eup %321  ;;  %v95_v57 = vsel %vm36_vm0, %v320_v51, 0.0  ;;  %v164_v17 = vsel %vm36_vm0, %v149_v15, 0.0 }
  0xa8   :  { %v92_v55 = vsel %vm36_vm0, %v322_v53, 0.0  ;;  %v134_v6 = vpop.permute.xlu1 %133 }
  0xa9   :  { %90 = vadd.xlane.f32.xlu1 %v89_v52  ;;  %93 = vadd.xlane.f32.xlu0 %v92_v55  ;;  %vm143_vm7 = vcmp.eq.s32.totalorder %v478_v63, %v134_v6 }
  0xaa   :  { %v324_v56 = vpop.eup %323  ;;  %v150_v20 = vsel %vm143_vm7, %v458_v36, 0.0  ;;  %v549_v36 = vld [vmem:[%s581_s2 + $0x28] sm:$0xff] }
  0xab   :  { %v98_v58 = vsel %vm55_vm1, %v324_v56, 0.0  ;;  %v167_v22 = vsel %vm36_vm0, %v150_v20, 0.0  ;;  %v269_v38 = vsel %vm236_vm9, %v549_v36, 0.0 }
  0xac   :  { %v137_v12 = vpop.permute.xlu1 %136  ;;  %v270_v40 = vadd.f32 %v269_v38, %v268_v37 }
  0xad   :  { %96 = vadd.xlane.f32.xlu1 %v95_v57  ;;  %99 = vadd.xlane.f32.xlu0 %v98_v58  ;;  %vm144_vm8 = vcmp.eq.s32.totalorder %v478_v63, %v137_v12 }
  0xae   :  { %v151_v19 = vsel %vm144_vm8, %v464_v41, 0.0  ;;  %v271_v41 = vsel %vm248_vm10, %v556_v39, 0.0 }
  0xaf   :  { %v170_v21 = vsel %vm55_vm1, %v151_v19, 0.0  ;;  %v272_v42 = vadd.f32 %v271_v41, %v270_v40 }
  0xb1   :  { %174 = vadd.xlane.f32.xlu1 %v173_v61  ;;  %177 = vadd.xlane.f32.xlu0 %v176_v62 }
  0xb5   :  { %180 = vadd.xlane.f32.xlu1 %v179_v1  ;;  %183 = vadd.xlane.f32.xlu0 %v182_v2 }
  0xb9   :  { %186 = vadd.xlane.f32.xlu1 %v185_v4  ;;  %189 = vadd.xlane.f32.xlu0 %v188_v5 }
  0xbd   :  { %192 = vadd.xlane.f32.xlu1 %v191_v8  ;;  %153 = vadd.xlane.f32.xlu0 %v152_v9 }
  0xc1   :  { %159 = vadd.xlane.f32.xlu0 %v158_v13  ;;  %156 = vadd.xlane.f32.xlu1 %v155_v14 }
  0xc5   :  { %165 = vadd.xlane.f32.xlu0 %v164_v17  ;;  %162 = vadd.xlane.f32.xlu1 %v161_v18 }
  0xc9   :  { %171 = vadd.xlane.f32.xlu0 %v170_v21  ;;  %168 = vadd.xlane.f32.xlu1 %v167_v22 }
  0xcd   :  { %273 = vadd.xlane.f32.xlu0 %v272_v42 }
 0x12a   :  { %v82_v43 = vpop.xlane.xlu1 %81 }
 0x12b   :  { %325 = vlog2.f32 %v82_v43 }
 0x12e   :  { %v88_v44 = vpop.xlane.xlu1 %87  ;;  %v85_v45 = vpop.xlane.xlu0 %84 }
 0x12f   :  { %327 = vlog2.f32 %v88_v44 }
 0x130   :  { %329 = vlog2.f32 %v85_v45 }
 0x132   :  { %v91_v46 = vpop.xlane.xlu1 %90  ;;  %v94_v47 = vpop.xlane.xlu0 %93 }
 0x133   :  { %331 = vlog2.f32 %v91_v46 }
 0x134   :  { %333 = vlog2.f32 %v94_v47 }
 0x136   :  { %v97_v48 = vpop.xlane.xlu1 %96  ;;  %v100_v49 = vpop.xlane.xlu0 %99 }
 0x137   :  { %335 = vlog2.f32 %v97_v48 }
 0x138   :  { %v326_v50 = vpop.eup %325  ;;  %337 = vlog2.f32 %v100_v49 }
 0x139   :  { %v102_v51 = vmul.f32 0.6931472, %v326_v50 }
 0x13a   :  { %v175_v52 = vpop.xlane.xlu1 %174  ;;  %v178_v53 = vpop.xlane.xlu0 %177 }
 0x13b   :  { %v201_v54 = vmul.f32 32.0, %v102_v51 }
 0x13c   :  { %v328_v55 = vpop.eup %327 }
 0x13d   :  { %v330_v56 = vpop.eup %329  ;;  %v106_v57 = vmul.f32 0.6931472, %v328_v55  ;;  %v208_v58 = vsub.f32 %v175_v52, %v201_v54 }
 0x13e   :  { %v104_v59 = vmul.f32 0.6931472, %v330_v56  ;;  %v181_v60 = vpop.xlane.xlu1 %180  ;;  %v184_v61 = vpop.xlane.xlu0 %183 }
 0x13f   :  { %v203_v62 = vmul.f32 32.0, %v106_v57  ;;  %339 = vrcp.f32 %v208_v58 }
 0x140   :  { %v332_v0 = vpop.eup %331  ;;  %v202_v1 = vmul.f32 32.0, %v104_v59 }
 0x141   :  { %v334_v2 = vpop.eup %333  ;;  %v108_v3 = vmul.f32 0.6931472, %v332_v0  ;;  %v210_v4 = vsub.f32 %v181_v60, %v203_v62 }
 0x142   :  { %v110_v5 = vmul.f32 0.6931472, %v334_v2  ;;  %v209_v6 = vsub.f32 %v178_v53, %v202_v1  ;;  %v187_v7 = vpop.xlane.xlu1 %186  ;;  %v190_v8 = vpop.xlane.xlu0 %189 }
 0x143   :  { %341 = vrcp.f32 %v210_v4  ;;  %v204_v9 = vmul.f32 32.0, %v108_v3 }
 0x144   :  { %v336_v10 = vpop.eup %335  ;;  %343 = vrcp.f32 %v209_v6  ;;  %v205_v11 = vmul.f32 32.0, %v110_v5 }
 0x145   :  { %v338_v12 = vpop.eup %337  ;;  %v112_v13 = vmul.f32 0.6931472, %v336_v10  ;;  %v211_v14 = vsub.f32 %v184_v61, %v204_v9 }
 0x146   :  { %v114_v15 = vmul.f32 0.6931472, %v338_v12  ;;  %v212_v16 = vsub.f32 %v187_v7, %v205_v11  ;;  %v193_v17 = vpop.xlane.xlu1 %192  ;;  %v154_v18 = vpop.xlane.xlu0 %153 }
 0x147   :  { %345 = vrcp.f32 %v211_v14  ;;  %v206_v19 = vmul.f32 32.0, %v112_v13  ;;  %v194_v24 = vsub.f32 %v154_v18, %v102_v51 }
 0x148   :  { %347 = vrcp.f32 %v212_v16  ;;  %v207_v20 = vmul.f32 32.0, %v114_v15 }
 0x149   :  { %v213_v21 = vsub.f32 %v190_v8, %v206_v19  ;;  %v215_v33 = vmul.f32 %v194_v24, %v514_v23 }
 0x14a   :  { %v214_v22 = vsub.f32 %v193_v17, %v207_v20  ;;  %v157_v26 = vpop.xlane.xlu1 %156  ;;  %v160_v27 = vpop.xlane.xlu0 %159 }
 0x14b   :  { %349 = vrcp.f32 %v213_v21  ;;  %v195_v29 = vsub.f32 %v157_v26, %v104_v59  ;;  %v196_v30 = vsub.f32 %v160_v27, %v106_v57 }
 0x14c   :  { %351 = vrcp.f32 %v214_v22  ;;  %v340_v32 = vpop.eup %339 }
 0x14d   :  { %v223_v41 = vmul.f32 %v340_v32, %v215_v33  ;;  %v216_v42 = vmul.f32 %v195_v29, %v521_v25  ;;  %v217_v43 = vmul.f32 %v196_v30, %v528_v28 }
 0x14e   :  { %v163_v35 = vpop.xlane.xlu1 %162  ;;  %v166_v37 = vpop.xlane.xlu0 %165 }
 0x14f   :  { %v197_v38 = vsub.f32 %v163_v35, %v108_v3  ;;  %v198_v44 = vsub.f32 %v166_v37, %v110_v5  ;;  %v237_v23 = vsel %vm236_vm9, %v223_v41, 0.0 }
 0x150   :  { %v342_v40 = vpop.eup %341 }
 0x151   :  { %v344_v45 = vpop.eup %343  ;;  %v227_v47 = vmul.f32 %v342_v40, %v217_v43  ;;  %v218_v50 = vmul.f32 %v197_v38, %v535_v31  ;;  %v219_v54 = vmul.f32 %v198_v44, %v542_v34 }
 0x152   :  { %v225_v46 = vmul.f32 %v344_v45, %v216_v42  ;;  %v169_v48 = vpop.xlane.xlu1 %168  ;;  %v172_v49 = vpop.xlane.xlu0 %171 }
 0x153   :  { %v199_v51 = vsub.f32 %v169_v48, %v112_v13  ;;  %v200_v55 = vsub.f32 %v172_v49, %v114_v15  ;;  %v240_v57 = vsel %vm236_vm9, %v227_v47, 0.0 }
 0x154   :  { %v346_v52 = vpop.eup %345  ;;  %v238_v53 = vsel %vm236_vm9, %v225_v46, 0.0 }
 0x155   :  { %v348_v25 = vpop.eup %347  ;;  %v239_v56 = vadd.f32 %v238_v53, %v237_v23  ;;  %v229_v28 = vmul.f32 %v346_v52, %v218_v50  ;;  %v220_v31 = vmul.f32 %v199_v51, %v549_v36  ;;  %v221_v62 = vmul.f32 %v200_v55, %v556_v39 }
 0x156   :  { %v231_v58 = vmul.f32 %v348_v25, %v219_v54  ;;  %v274_v9 = vpop.xlane.xlu0 %273 }
 0x157   :  { %v241_v59 = vadd.f32 %v240_v57, %v239_v56  ;;  %v242_v60 = vsel %vm236_vm9, %v229_v28, 0.0  ;;  %v275_v10 = vrot.slane %v274_v9, 4 }
 0x158   :  { %v350_v61 = vpop.eup %349  ;;  %v244_v34 = vsel %vm236_vm9, %v231_v58, 0.0 }
 0x159   :  { %v352_v0 = vpop.eup %351  ;;  %v233_v1 = vmul.f32 %v350_v61, %v220_v31  ;;  %v243_v2 = vadd.f32 %v242_v60, %v241_v59  ;;  %v276_v36 = vadd.f32 %v275_v10, %v274_v9 }
 0x15a   :  { %v235_v3 = vmul.f32 %v352_v0, %v221_v62 }
 0x15b   :  { %v245_v4 = vadd.f32 %v244_v34, %v243_v2  ;;  %v246_v5 = vsel %vm236_vm9, %v233_v1, 0.0  ;;  %v277_v11 = vrot.slane %v276_v36, 2 }
 0x15c   :  { %v249_v7 = vsel %vm248_vm10, %v235_v3, 0.0 }
 0x15d   :  { %v247_v6 = vadd.f32 %v246_v5, %v245_v4  ;;  %v278_v14 = vadd.f32 %v277_v11, %v276_v36 }
 0x15f   :  { %v250_v8 = vadd.f32 %v249_v7, %v247_v6  ;;  %v279_v17 = vrot.slane %v278_v14, 1 }
 0x161   :  { %251 = vadd.xlane.f32.xlu1 %v250_v8  ;;  %v280_v20 = vadd.f32 %v279_v17, %v278_v14 }
 0x1ea   :  { %v252_v12 = vpop.xlane.xlu1 %251 }
 0x1eb   :  { %v253_v39 = vrot.slane %v252_v12, 4 }
 0x1ed   :  { %v254_v13 = vadd.f32 %v253_v39, %v252_v12 }
 0x1ef   :  { %v255_v15 = vrot.slane %v254_v13, 2 }
 0x1f1   :  { %v256_v16 = vadd.f32 %v255_v15, %v254_v13 }
 0x1f3   :  { %v257_v18 = vrot.slane %v256_v16, 1 }
 0x1f5   :  { %v258_v19 = vadd.f32 %v257_v18, %v256_v16 }
 0x1f7   :  { %303 = vpush %v258_v19 }
 0x1f8   :  { %305 = vpush %v280_v20 }
 0x228   :  { %s304_s2 = spop %303 }
 0x229   :  { %v286_v21 = vstv %s304_s2  ;;  %s306_s27 = spop %305 }
 0x22a   :  { %v284_v22 = vstv %s306_s27 }
 0x22b   :  { %v285_v24 = vsel %vm283_vm11, %v284_v22, 0.0 }
 0x22c   :  { %v287_v26 = vsel %vm282_vm12, %v286_v21, %v285_v24 }
 0x22d   :  { %288 = vst [vmem:[#allocation2] sm:$0x1] %v287_v26 }
 0x22e   :  { %364 = shalt.err (!%p361_p4)
}
 0x22f   :  { %298 = dma.vmem_to_hbm [thread:$0]  %s296_s26, 16, %s582_s3, [#allocation3]  }
 0x230   :  { %373 = dma.done.wait [#allocation3], 16  }
 0x231   :  { %374 = vsyncadd [#allocation3], 4294967280 }
 0x232   :  { %302 = vsyncpa [#allocation3], 1 }

</bundles_post_ra>
